<compile_context>
chip_gen: v7x
topology: tpu7x:2x2x1
jax: 0.10.0
libtpu: 0.0.40
codegen_flags: <defaults>
</compile_context>

<pallas_src>
import functools

import jax
import jax.numpy as jnp
from jax.experimental import pallas as pl
from jax.experimental.pallas import tpu as pltpu


def _round_up(x, m):
    return (x + m - 1) // m * m


def _choose_tm(ms):
    # Target ~8 tiles per sample while keeping the tile lane-dense: tm is a
    # multiple of 256 (lane multiple of 128; bf16 sublane packing multiple of
    # 16), clamped to [256, 2048] so the double-buffered footprint
    # (~4-5 MiB at tm=2048 with Kp=256, Ep=128) stays far below the default
    # scoped-VMEM limit on v5e / v6e / v7x.
    tm = _round_up(max(1, -(-ms // 8)), 256)
    return max(256, min(2048, tm))


# ----------------------------- Pallas kernel ------------------------------ #
def _patch_proj_kernel(x_ref, w_ref, b_ref, o_ref):
    # x_ref: (1, tm, Kp) bf16   w_ref: (Ep, Kp) bf16   b_ref: (Ep, 1) f32
    # o_ref: (1, Ep, tm) f32
    # Contract the shared K (lane) dim of W and X -> (Ep, tm).  This IS the
    # transposed projection, so the wrapper never has to transpose the result
    # back into the conv's channel-major output layout.  bf16 MXU matmul with
    # f32 accumulation; bias broadcast along lanes on the VPU.
    acc = jax.lax.dot_general(
        w_ref[...], x_ref[0],
        dimension_numbers=(((1,), (1,)), ((), ())),
        preferred_element_type=jnp.float32,
    )
    o_ref[0] = (acc + b_ref[...]).astype(o_ref.dtype)


def _patch_proj(patches, w2d, b2d, *, tm):
    # patches: (N, Msp, Kp) bf16, w2d: (Ep, Kp) bf16, b2d: (Ep, 1) f32
    N, Msp, Kp = patches.shape
    Ep, _ = w2d.shape
    grid = (N, Msp // tm)
    flops = 2 * N * Msp * Kp * Ep
    bytes_accessed = (N * Msp * Kp * 2      # bf16 patches (streamed)
                      + Kp * Ep * 2         # bf16 weight (resident)
                      + Ep * 4              # f32 bias (resident)
                      + N * Ep * Msp * 4)   # f32 output
    return pl.pallas_call(
        _patch_proj_kernel,
        out_shape=jax.ShapeDtypeStruct((N, Ep, Msp), jnp.float32),
        grid_spec=pltpu.PrefetchScalarGridSpec(
            num_scalar_prefetch=0,
            grid=grid,
            in_specs=[
                pl.BlockSpec((1, tm, Kp), lambda n, i: (n, i, 0)),  # patch rows
                pl.BlockSpec((Ep, Kp), lambda n, i: (0, 0)),        # resident weight
                pl.BlockSpec((Ep, 1), lambda n, i: (0, 0)),         # resident bias
            ],
            out_specs=pl.BlockSpec((1, Ep, tm), lambda n, i: (n, 0, i)),
        ),
        compiler_params=pltpu.CompilerParams(
            # No reduction axis: both grid axes are independent -> megacore /
            # dual-TensorCore sharding on v7x.
            dimension_semantics=("parallel", "parallel"),
        ),
        cost_estimate=pl.CostEstimate(
            flops=flops, transcendentals=0, bytes_accessed=bytes_accessed),
    )(patches, w2d, b2d)


# --------------------------- Jitted forward pass --------------------------- #
@functools.partial(jax.jit, static_argnames=("patch_size",))
def patch_embed3d_forward(x, weight, bias, *, patch_size):
    # x: (N, C, D, H, W) f32 (PyTorch NCDHW); weight: (E, C, pd, ph, pw) f32;
    # bias: (E,) f32.  Returns (N, E, Dp, Hp, Wp) f32 (conv output layout).
    N, C, D, H, W = x.shape
    pd, ph, pw = patch_size
    E = weight.shape[0]

    # bf16 inputs: halves HBM bytes for the patch-extraction pass and the
    # kernel's streaming reads; the matmul still accumulates in f32.
    xb = x.astype(jnp.bfloat16)

    # Right-pad each spatial axis up to a multiple of the patch size
    # (matches the module's F.pad calls).
    pad_d, pad_h, pad_w = (-D) % pd, (-H) % ph, (-W) % pw
    if pad_d or pad_h or pad_w:
        xb = jnp.pad(xb, ((0, 0), (0, 0), (0, pad_d), (0, pad_h), (0, pad_w)))
    D2, H2, W2 = D + pad_d, H + pad_h, W + pad_w
    Dp, Hp, Wp = D2 // pd, H2 // ph, W2 // pw

    # Patch extraction -> per-sample matmul rows (bf16 XLA glue, fused by jit).
    # TODO(synk): fully fusing this rearrange into the kernel (BlockSpec over
    # the padded NCDHW input + in-VMEM rearrange) would save its HBM pass.
    xp = xb.reshape(N, C, Dp, pd, Hp, ph, Wp, pw)
    xp = xp.transpose(0, 2, 4, 6, 1, 3, 5, 7)       # (N,Dp,Hp,Wp,C,pd,ph,pw)
    Ms = Dp * Hp * Wp
    K = C * pd * ph * pw
    patches = xp.reshape(N, Ms, K)                  # (N, Ms, K) bf16

    # Lane/sublane-dense padding: K, E -> multiples of 128; M -> tile multiple.
    Kp = _round_up(K, 128)
    Ep = _round_up(E, 128)
    tm = _choose_tm(Ms)
    Msp = _round_up(Ms, tm)
    patches = jnp.pad(patches, ((0, 0), (0, Msp - Ms), (0, Kp - K)))

    w2d = weight.reshape(E, K)                                      # (E, K) f32
    w2d = jnp.pad(w2d, ((0, Ep - E), (0, Kp - K))).astype(jnp.bfloat16)
    b2d = jnp.pad(bias.reshape(E, 1), ((0, Ep - E), (0, 0)))        # (Ep, 1) f32

    out = _patch_proj(patches, w2d, b2d, tm=tm)     # (N, Ep, Msp) f32 — hot path

    # Slice away padding; channel-major layout falls out without a transpose.
    out = out[:, :E, :Ms].reshape(N, E, Dp, Hp, Wp)
    return out


# ------------------------------ Module port ------------------------------- #
class PatchEmbed3DPallas:
    """JAX/Pallas port of PatchEmbed3D (norm_layer=None)."""

    def __init__(self, patch_size=(4, 4, 4), in_chans=3, embed_dim=96, key=None):
        self.patch_size = tuple(patch_size)
        self.in_chans = in_chans
        self.embed_dim = embed_dim
        if key is None:
            key = jax.random.PRNGKey(0)
        kw, kb = jax.random.split(key)
        pd, ph, pw = self.patch_size
        fan_in = in_chans * pd * ph * pw
        bound = 1.0 / jnp.sqrt(fan_in)
        # Conv3d weight: (embed_dim, in_chans, pd, ph, pw); bias: (embed_dim,)
        self.weight = jax.random.uniform(
            kw, (embed_dim, in_chans, pd, ph, pw), jnp.float32, -bound, bound)
        self.bias = jax.random.uniform(kb, (embed_dim,), jnp.float32, -bound, bound)
        # norm_layer defaults to None in the module, so forward semantics are complete.

    def __call__(self, x):
        return patch_embed3d_forward(x, self.weight, self.bias,
                                     patch_size=self.patch_size)


# ------------------------------- Reference -------------------------------- #
def _reference(x, weight, bias, patch_size):
    # Reference uses the same bf16 quantization of inputs so the comparison
    # only measures accumulation-order differences (tiny, f32-level).
    pd, ph, pw = patch_size
    N, C, D, H, W = x.shape
    pad_d, pad_h, pad_w = (-D) % pd, (-H) % ph, (-W) % pw
    xq = x.astype(jnp.bfloat16).astype(jnp.float32)
    wq = weight.astype(jnp.bfloat16).astype(jnp.float32)
    xq = jnp.pad(xq, ((0, 0), (0, 0), (0, pad_d), (0, pad_h), (0, pad_w)))
    out = jax.lax.conv_general_dilated(
        xq, wq, window_strides=(pd, ph, pw), padding="VALID",
        dimension_numbers=("NCDHW", "OIDHW", "NCDHW"),
        preferred_element_type=jnp.float32,
    )
    return out + bias.reshape(1, -1, 1, 1, 1)


# --------------------------------- Main ------------------------------------ #
if __name__ == "__main__":
    key = jax.random.PRNGKey(0)
    k_x, k_p = jax.random.split(key)

    # Small shapes that also exercise the spatial-padding path:
    # batch=2, in_chans=3, spatial 10x12x14, patch (4,4,4), embed_dim=96.
    N, C, D, H, W = 2, 3, 10, 12, 14
    x = jax.random.normal(k_x, (N, C, D, H, W), jnp.float32)

    module = PatchEmbed3DPallas(patch_size=(4, 4, 4), in_chans=C, embed_dim=96, key=k_p)

    out = jax.block_until_ready(module(x))

    ref = _reference(x, module.weight, module.bias, module.patch_size)
    assert out.shape == ref.shape, (out.shape, ref.shape)
    max_err = float(jnp.max(jnp.abs(out - ref)))
    assert max_err < 2e-3, max_err

    print("KERNEL_OK")
</pallas_src>

<mosaic_0001>
module attributes {stable_mosaic.version = 11 : i64} {
  func.func @_patch_proj_kernel(%arg0: i32, %arg1: i32, %arg2: memref<1x256x256xbf16, #tpu.memory_space<vmem>>, %arg3: memref<128x256xbf16, #tpu.memory_space<vmem>>, %arg4: memref<128x1xf32, #tpu.memory_space<vmem>>, %arg5: memref<1x128x256xf32, #tpu.memory_space<vmem>>) attributes {dimension_semantics = [#tpu.dimension_semantics<parallel>, #tpu.dimension_semantics<parallel>], iteration_bounds = array<i64: 2, 1>, scalar_prefetch = 0 : i64, scratch_operands = 0 : i64, tpu.core_type = #tpu.core_type<tc>, window_params = [{transform_indices = @transform_0, window_bounds = array<i64: 1, 256, 256>}, {pipeline_mode = #tpu.pipeline_mode<synchronous>, transform_indices = @transform_1, window_bounds = array<i64: 128, 256>}, {pipeline_mode = #tpu.pipeline_mode<synchronous>, transform_indices = @transform_2, window_bounds = array<i64: 128, 1>}, {transform_indices = @transform_3, window_bounds = array<i64: 1, 128, 256>}]} {
    %c0 = arith.constant 0 : index
    %c0_0 = arith.constant 0 : index
    %0 = vector.load %arg3[%c0, %c0_0] : memref<128x256xbf16, #tpu.memory_space<vmem>>, vector<128x256xbf16>
    %c0_1 = arith.constant 0 : index
    %c0_2 = arith.constant 0 : index
    %c0_3 = arith.constant 0 : index
    %1 = vector.load %arg2[%c0_1, %c0_2, %c0_3] : memref<1x256x256xbf16, #tpu.memory_space<vmem>>, vector<1x256x256xbf16>
    %2 = vector.shape_cast %1 : vector<1x256x256xbf16> to vector<256x256xbf16>
    %cst = arith.constant dense<0.000000e+00> : vector<128x256xf32>
    %3 = tpu.matmul %0, %2, %cst {dimension_numbers = #tpu.dot_dimension_numbers<[1], [1], [0], [0], [0, 0, 1, 0], [], []>} : vector<128x256xbf16>, vector<256x256xbf16>, vector<128x256xf32> -> vector<128x256xf32>
    %c0_4 = arith.constant 0 : index
    %c0_5 = arith.constant 0 : index
    %4 = vector.load %arg4[%c0_4, %c0_5] : memref<128x1xf32, #tpu.memory_space<vmem>>, vector<128x1xf32>
    %5 = vector.broadcast %4 : vector<128x1xf32> to vector<128x256xf32>
    %6 = arith.addf %3, %5 : vector<128x256xf32>
    %c0_6 = arith.constant 0 : index
    %c0_7 = arith.constant 0 : index
    %c0_8 = arith.constant 0 : index
    %7 = vector.load %arg5[%c0_6, %c0_7, %c0_8] : memref<1x128x256xf32, #tpu.memory_space<vmem>>, vector<1x128x256xf32>
    %8 = vector.shape_cast %7 : vector<1x128x256xf32> to vector<128x256xf32>
    %9 = vector.shape_cast %6 : vector<128x256xf32> to vector<1x128x256xf32>
    tpu.vector_store %arg5[%c0_6, %c0_7, %c0_8], %9 {strides = array<i32>} : memref<1x128x256xf32, #tpu.memory_space<vmem>>, vector<1x128x256xf32>,
    return
  }
  func.func @transform_0(%arg0: i32, %arg1: i32) -> (i32, i32, i32) {
    %c0_i32 = arith.constant 0 : i32
    %c0_i32_0 = arith.constant 0 : i32
    return %arg0, %arg1, %c0_i32 : i32, i32, i32
  }
  func.func @transform_1(%arg0: i32, %arg1: i32) -> (i32, i32) {
    %c0_i32 = arith.constant 0 : i32
    %c0_i32_0 = arith.constant 0 : i32
    %c0_i32_1 = arith.constant 0 : i32
    return %c0_i32, %c0_i32_0 : i32, i32
  }
  func.func @transform_2(%arg0: i32, %arg1: i32) -> (i32, i32) {
    %c0_i32 = arith.constant 0 : i32
    %c0_i32_0 = arith.constant 0 : i32
    %c0_i32_1 = arith.constant 0 : i32
    return %c0_i32, %c0_i32_0 : i32, i32
  }
  func.func @transform_3(%arg0: i32, %arg1: i32) -> (i32, i32, i32) {
    %c0_i32 = arith.constant 0 : i32
    %c0_i32_0 = arith.constant 0 : i32
    return %arg0, %c0_i32, %arg1 : i32, i32, i32
  }
}

</mosaic_0001>

<bundles_post_ra>
// kernel: patch_embed3d_forward.1
= control target key start
LH: loop header
LB: loop body
LE: loop exit
PB: predicated region body
PF: predicated region fallthrough
CT: control target
= control target key end

     0   :  { %s1069_s12 = smov 0   ;;  %s1071_s13 = smov 0   ;;  %s1289_s0 = inlined_call_operand.vmem [shape: bf16[2,256,256], index: 0, kind: input, shape index: {}]   ;;  %s1290_s1 = inlined_call_operand.vmem [shape: bf16[128,256], index: 1, kind: input, shape index: {}]   ;;  %s1291_s2 = inlined_call_operand.vmem [shape: f32[128,1], index: 2, kind: input, shape index: {}]   ;;  %s1292_s3 = inlined_call_operand.vmem [shape: f32[2,128,256], index: 3, kind: output, shape index: {}]  }
   0x1   :  { %s1073_s14 = smov 0  }
   0x2 LB: > { %s25_s15 = sadd.s32 1, %s1042_s13  ;;  %p836_p0 = scmp.ge.s32.totalorder %s1046_s14, 1  ;;  %s1046_s14 = sphi %s1073_s14, %s13_s14   ;;  %s1042_s13 = sphi %s1071_s13, %s1294_s13   ;;  %s1038_s12 = sphi %s1069_s12, %s1293_s12  }
   0x3   : > { %p27_p1 = scmp.ge.s32.totalorder %s25_s15, 2  ;;  %p159_p2 = scmp.lt.s32.totalorder %s1046_s14, 3 }
   0x5   : > { %s1296_s15 = smov (%p27_p1, %s25_s15), 0  ;;  %p160_p3 = pnand %p836_p0, %p159_p2 }
   0x6   : > { %p193_p4 = scmp.lt.s32.totalorder (!%p160_p3), %s1038_s12, 1  ;;  %v1002_v0 = vld [vmem:[%s1290_s1 + $0x4] ss:$8 sps:$4 sm:$0xff] (!%p160_p3)   ;;  %v263_v11 = vld [vmem:[%s1291_s2 + $0x10] sm:$0xff] (!%p160_p3)  ;;  %v1048_v13 = vmov (!%p160_p3), 0   ;;  %v264_v15 = vld [vmem:[%s1291_s2 + $0x18] sm:$0xff] (!%p160_p3) }
   0x7   : > { %163 = sbr.rel (%p160_p3) target bundleno = 388 (0x184), region = 32  ;;  %v1005_v1 = vld [vmem:[%s1290_s1 + $0x44] ss:$8 sps:$4 sm:$0xff] (!%p160_p3)   ;;  %629 = vmatprep.mubr.bf16.mxu0 (!%p160_p3), %v1002_v0  ;;  %951 = vset.pattern.permute.xlu1 (!%p160_p3), %v1048_v13  ;;  %v268_v21 = vld [vmem:[%s1291_s2 + $0x38] sm:$0xff] (!%p160_p3)  ;;  %v267_v22 = vld [vmem:[%s1291_s2 + $0x30] sm:$0xff] (!%p160_p3) }
   0x8   : > { %669 = vmatprep.mubr.bf16.mxu1 (!%p160_p3), %v1005_v1  ;;  %v261_v12 = vld [vmem:[%s1291_s2] sm:$0xff] (!%p160_p3)  ;;  %950 = vset.pattern.permute.xlu0 (!%p160_p3), %v1048_v13  ;;  %v262_v16 = vld [vmem:[%s1291_s2 + $0x8] sm:$0xff] (!%p160_p3)  ;;  %v272_v27 = vld [vmem:[%s1291_s2 + $0x58] sm:$0xff] (!%p160_p3) }
   0x9   : > { %289 = vperm.xlu1 (!%p160_p3), %951, %v263_v11   ;;  %279 = vperm.xlu0 (!%p160_p3), %950, %v261_v12   ;;  %v266_v18 = vld [vmem:[%s1291_s2 + $0x28] sm:$0xff] (!%p160_p3)  ;;  %v265_v19 = vld [vmem:[%s1291_s2 + $0x20] sm:$0xff] (!%p160_p3)  ;;  %v271_v28 = vld [vmem:[%s1291_s2 + $0x50] sm:$0xff] (!%p160_p3) }
   0xa   : > { %v270_v24 = vld [vmem:[%s1291_s2 + $0x48] sm:$0xff] (!%p160_p3)  ;;  %v269_v25 = vld [vmem:[%s1291_s2 + $0x40] sm:$0xff] (!%p160_p3)  ;;  %v276_v33 = vld [vmem:[%s1291_s2 + $0x78] sm:$0xff] (!%p160_p3) }
   0xb   : > { %v274_v30 = vld [vmem:[%s1291_s2 + $0x68] sm:$0xff] (!%p160_p3)  ;;  %v273_v31 = vld [vmem:[%s1291_s2 + $0x60] sm:$0xff] (!%p160_p3)  ;;  %v275_v34 = vld [vmem:[%s1291_s2 + $0x70] sm:$0xff] (!%p160_p3) }
   0xc   : > { %v1000_v51 = vld [vmem:[%s1290_s1] ss:$8 sps:$4 sm:$0xff] (!%p160_p3)   ;;  %v1006_v53 = vld [vmem:[%s1290_s1 + $0x14] ss:$8 sps:$4 sm:$0xff] (!%p160_p3)   ;;  %v1010_v55 = vld [vmem:[%s1290_s1 + $0x10] ss:$8 sps:$4 sm:$0xff] (!%p160_p3)  }
   0xd   : > { %294 = vperm.xlu1 (!%p160_p3), %951, %v264_v15   ;;  %284 = vperm.xlu0 (!%p160_p3), %950, %v262_v16   ;;  %v1003_v52 = vld [vmem:[%s1290_s1 + $0x40] ss:$8 sps:$4 sm:$0xff] (!%p160_p3)   ;;  %v1008_v54 = vld [vmem:[%s1290_s1 + $0x54] ss:$8 sps:$4 sm:$0xff] (!%p160_p3)   ;;  %v1011_v56 = vld [vmem:[%s1290_s1 + $0x50] ss:$8 sps:$4 sm:$0xff] (!%p160_p3)  }
   0xe   : > { %s1298_s12 = smov (!%p193_p4, %s1038_s12), 1  ;;  %v1012_v57 = vld [vmem:[%s1290_s1 + $0x24] ss:$8 sps:$4 sm:$0xff]   ;;  %v1016_v59 = vld [vmem:[%s1290_s1 + $0x20] ss:$8 sps:$4 sm:$0xff]  }
   0xf   : > { %s891_s20 = sshll.u32 %s1298_s12, 8  ;;  %v1014_v58 = vld [vmem:[%s1290_s1 + $0x64] ss:$8 sps:$4 sm:$0xff]   ;;  %v1017_v60 = vld [vmem:[%s1290_s1 + $0x60] ss:$8 sps:$4 sm:$0xff]  }
  0x10   : > { %s1101_s23 = scalar_lea.vmem %s1289_s0, %s891_s20  ;;  %v1018_v61 = vld [vmem:[%s1290_s1 + $0x34] ss:$8 sps:$4 sm:$0xff]   ;;  %v1022_v63 = vld [vmem:[%s1290_s1 + $0x30] ss:$8 sps:$4 sm:$0xff]  }
  0x11   : > { %v952_v2 = vld [vmem:[%s1101_s23 + $0x4] ss:$8 sps:$4 sm:$0xff]   ;;  %v954_v3 = vld [vmem:[%s1101_s23] ss:$8 sps:$4 sm:$0xff]   ;;  %v955_v4 = vld [vmem:[%s1101_s23 + $0x14] ss:$8 sps:$4 sm:$0xff]   ;;  %304 = vperm.xlu1 %951, %v266_v18   ;;  %299 = vperm.xlu0 %950, %v265_v19  }
  0x12   : > { %597 = vmatprep.subr.bf16.mxu0 %v952_v2  ;;  %893 = vmatprep.subr.bf16.mxu1 %v952_v2  ;;  %v957_v5 = vld [vmem:[%s1101_s23 + $0x10] ss:$8 sps:$4 sm:$0xff]   ;;  %v958_v6 = vld [vmem:[%s1101_s23 + $0x24] ss:$8 sps:$4 sm:$0xff]   ;;  %v960_v7 = vld [vmem:[%s1101_s23 + $0x20] ss:$8 sps:$4 sm:$0xff]  }
  0x13   : > { %598 = vmatpush1.bf16.xpose.msra.mxu0 %v954_v3  ;;  %909 = vmatpush1.bf16.xpose.msra.mxu1 %v954_v3  ;;  %v961_v8 = vld [vmem:[%s1101_s23 + $0x34] ss:$8 sps:$4 sm:$0xff]   ;;  %v963_v9 = vld [vmem:[%s1101_s23 + $0x30] ss:$8 sps:$4 sm:$0xff]   ;;  %v964_v10 = vld [vmem:[%s1101_s23 + $0x44] ss:$8 sps:$4 sm:$0xff]  }
  0x14   : > { %599 = vmatprep.subr.bf16.mxu0 %v955_v4  ;;  %894 = vmatprep.subr.bf16.mxu1 %v955_v4  ;;  %v966_v14 = vld [vmem:[%s1101_s23 + $0x40] ss:$8 sps:$4 sm:$0xff]   ;;  %v967_v17 = vld [vmem:[%s1101_s23 + $0x54] ss:$8 sps:$4 sm:$0xff]   ;;  %v969_v20 = vld [vmem:[%s1101_s23 + $0x50] ss:$8 sps:$4 sm:$0xff]  }
  0x15   : > { %v970_v23 = vld [vmem:[%s1101_s23 + $0x64] ss:$8 sps:$4 sm:$0xff]   ;;  %314 = vperm.xlu1 %951, %v268_v21   ;;  %309 = vperm.xlu0 %950, %v267_v22   ;;  %v972_v26 = vld [vmem:[%s1101_s23 + $0x60] ss:$8 sps:$4 sm:$0xff]   ;;  %v973_v29 = vld [vmem:[%s1101_s23 + $0x74] ss:$8 sps:$4 sm:$0xff]  }
  0x16   : > { %v975_v32 = vld [vmem:[%s1101_s23 + $0x70] ss:$8 sps:$4 sm:$0xff]   ;;  %v976_v35 = vld [vmem:[%s1101_s23 + $0x84] ss:$8 sps:$4 sm:$0xff]   ;;  %v978_v36 = vld [vmem:[%s1101_s23 + $0x80] ss:$8 sps:$4 sm:$0xff]  }
  0x17   : > { %v979_v37 = vld [vmem:[%s1101_s23 + $0x94] ss:$8 sps:$4 sm:$0xff]   ;;  %v981_v38 = vld [vmem:[%s1101_s23 + $0x90] ss:$8 sps:$4 sm:$0xff]   ;;  %v982_v39 = vld [vmem:[%s1101_s23 + $0xa4] ss:$8 sps:$4 sm:$0xff]  }
  0x18   : > { %v984_v40 = vld [vmem:[%s1101_s23 + $0xa0] ss:$8 sps:$4 sm:$0xff]   ;;  %v985_v41 = vld [vmem:[%s1101_s23 + $0xb4] ss:$8 sps:$4 sm:$0xff]   ;;  %v987_v42 = vld [vmem:[%s1101_s23 + $0xb0] ss:$8 sps:$4 sm:$0xff]  }
  0x19   : > { %324 = vperm.xlu1 %951, %v270_v24   ;;  %319 = vperm.xlu0 %950, %v269_v25   ;;  %v988_v43 = vld [vmem:[%s1101_s23 + $0xc4] ss:$8 sps:$4 sm:$0xff]   ;;  %v990_v44 = vld [vmem:[%s1101_s23 + $0xc0] ss:$8 sps:$4 sm:$0xff]   ;;  %v991_v45 = vld [vmem:[%s1101_s23 + $0xd4] ss:$8 sps:$4 sm:$0xff]  }
  0x1a   : > { %v993_v46 = vld [vmem:[%s1101_s23 + $0xd0] ss:$8 sps:$4 sm:$0xff]   ;;  %v994_v47 = vld [vmem:[%s1101_s23 + $0xe4] ss:$8 sps:$4 sm:$0xff]   ;;  %v996_v48 = vld [vmem:[%s1101_s23 + $0xe0] ss:$8 sps:$4 sm:$0xff]  }
  0x1b   : > { %600 = vmatpush1.bf16.xpose.msra.mxu0 %v957_v5  ;;  %910 = vmatpush1.bf16.xpose.msra.mxu1 %v957_v5  ;;  %v997_v49 = vld [vmem:[%s1101_s23 + $0xf4] ss:$8 sps:$4 sm:$0xff]   ;;  %v999_v50 = vld [vmem:[%s1101_s23 + $0xf0] ss:$8 sps:$4 sm:$0xff]   ;;  %s1238_s23 = scalar_lea.vmem %s1292_s3, %s891_s20 }
  0x1c   : > { %601 = vmatprep.subr.bf16.mxu0 %v958_v6  ;;  %895 = vmatprep.subr.bf16.mxu1 %v958_v6  ;;  %v1020_v62 = vld [vmem:[%s1290_s1 + $0x74] ss:$8 sps:$4 sm:$0xff]   ;;  %v1023_v0 = vld [vmem:[%s1290_s1 + $0x70] ss:$8 sps:$4 sm:$0xff]  }
  0x1d   : > { %334 = vperm.xlu1 %951, %v272_v27   ;;  %329 = vperm.xlu0 %950, %v271_v28  }
  0x21   : > { %344 = vperm.xlu1 %951, %v274_v30   ;;  %339 = vperm.xlu0 %950, %v273_v31  }
  0x23   : > { %602 = vmatpush1.bf16.xpose.msra.mxu0 %v960_v7  ;;  %911 = vmatpush1.bf16.xpose.msra.mxu1 %v960_v7 }
  0x24   : > { %603 = vmatprep.subr.bf16.mxu0 %v961_v8  ;;  %896 = vmatprep.subr.bf16.mxu1 %v961_v8 }
  0x25   : > { %354 = vperm.xlu1 %951, %v276_v33   ;;  %349 = vperm.xlu0 %950, %v275_v34  }
  0x2b   : > { %604 = vmatpush1.bf16.xpose.msra.mxu0 %v963_v9  ;;  %912 = vmatpush1.bf16.xpose.msra.mxu1 %v963_v9 }
  0x2c   : > { %605 = vmatprep.subr.bf16.mxu0 %v964_v10  ;;  %897 = vmatprep.subr.bf16.mxu1 %v964_v10 }
  0x33   : > { %606 = vmatpush1.bf16.xpose.msra.mxu0 %v966_v14  ;;  %913 = vmatpush1.bf16.xpose.msra.mxu1 %v966_v14 }
  0x34   : > { %607 = vmatprep.subr.bf16.mxu0 %v967_v17  ;;  %898 = vmatprep.subr.bf16.mxu1 %v967_v17 }
  0x3b   : > { %608 = vmatpush1.bf16.xpose.msra.mxu0 %v969_v20  ;;  %914 = vmatpush1.bf16.xpose.msra.mxu1 %v969_v20 }
  0x3c   : > { %609 = vmatprep.subr.bf16.mxu0 %v970_v23  ;;  %899 = vmatprep.subr.bf16.mxu1 %v970_v23 }
  0x43   : > { %610 = vmatpush1.bf16.xpose.msra.mxu0 %v972_v26  ;;  %915 = vmatpush1.bf16.xpose.msra.mxu1 %v972_v26 }
  0x44   : > { %611 = vmatprep.subr.bf16.mxu0 %v973_v29  ;;  %900 = vmatprep.subr.bf16.mxu1 %v973_v29 }
  0x4b   : > { %612 = vmatpush1.bf16.xpose.msra.mxu0 %v975_v32  ;;  %916 = vmatpush1.bf16.xpose.msra.mxu1 %v975_v32 }
  0x4c   : > { %613 = vmatprep.subr.bf16.mxu0 %v976_v35  ;;  %901 = vmatprep.subr.bf16.mxu1 %v976_v35 }
  0x53   : > { %614 = vmatpush1.bf16.xpose.msra.mxu0 %v978_v36  ;;  %917 = vmatpush1.bf16.xpose.msra.mxu1 %v978_v36 }
  0x54   : > { %615 = vmatprep.subr.bf16.mxu0 %v979_v37  ;;  %902 = vmatprep.subr.bf16.mxu1 %v979_v37 }
  0x5b   : > { %616 = vmatpush1.bf16.xpose.msra.mxu0 %v981_v38  ;;  %918 = vmatpush1.bf16.xpose.msra.mxu1 %v981_v38 }
  0x5c   : > { %617 = vmatprep.subr.bf16.mxu0 %v982_v39  ;;  %903 = vmatprep.subr.bf16.mxu1 %v982_v39 }
  0x63   : > { %618 = vmatpush1.bf16.xpose.msra.mxu0 %v984_v40  ;;  %919 = vmatpush1.bf16.xpose.msra.mxu1 %v984_v40 }
  0x64   : > { %619 = vmatprep.subr.bf16.mxu0 %v985_v41  ;;  %904 = vmatprep.subr.bf16.mxu1 %v985_v41 }
  0x6b   : > { %620 = vmatpush1.bf16.xpose.msra.mxu0 %v987_v42  ;;  %920 = vmatpush1.bf16.xpose.msra.mxu1 %v987_v42 }
  0x6c   : > { %621 = vmatprep.subr.bf16.mxu0 %v988_v43  ;;  %905 = vmatprep.subr.bf16.mxu1 %v988_v43 }
  0x73   : > { %622 = vmatpush1.bf16.xpose.msra.mxu0 %v990_v44  ;;  %921 = vmatpush1.bf16.xpose.msra.mxu1 %v990_v44 }
  0x74   : > { %623 = vmatprep.subr.bf16.mxu0 %v991_v45  ;;  %906 = vmatprep.subr.bf16.mxu1 %v991_v45 }
  0x7b   : > { %624 = vmatpush1.bf16.xpose.msra.mxu0 %v993_v46  ;;  %922 = vmatpush1.bf16.xpose.msra.mxu1 %v993_v46 }
  0x7c   : > { %625 = vmatprep.subr.bf16.mxu0 %v994_v47  ;;  %907 = vmatprep.subr.bf16.mxu1 %v994_v47 }
  0x83   : > { %626 = vmatpush1.bf16.xpose.msra.mxu0 %v996_v48  ;;  %923 = vmatpush1.bf16.xpose.msra.mxu1 %v996_v48 }
  0x84   : > { %627 = vmatprep.subr.bf16.mxu0 %v997_v49  ;;  %908 = vmatprep.subr.bf16.mxu1 %v997_v49 }
  0x88   : > { %v290_v1 = vpop.permute.xlu1 %289  ;;  %v280_v2 = vpop.permute.xlu0 %279 }
  0x8b   : > { %628 = vmatpush1.bf16.xpose.msra.mxu0 %v999_v50  ;;  %924 = vmatpush1.bf16.xpose.msra.mxu1 %v999_v50 }
  0x8c   : > { %v295_v3 = vpop.permute.xlu1 %294  ;;  %v285_v4 = vpop.permute.xlu0 %284 }
  0x90   : > { %v1225_v5 = vpop.permute.xlu1 %304  ;;  %v1227_v6 = vpop.permute.xlu0 %299 }
  0x92   : > { %630 = vmatmul.mubr.bf16.vlgmr.msra.gmra.mrb[0].mxu0 %v1000_v51  ;;  %670 = vmatmul.mubr.bf16.vlgmr.msra.gmra.mrb[0].mxu1 %v1003_v52 }
  0x93   : > { %639 = vmatprep.mubr.bf16.mxu0 %v1006_v53  ;;  %679 = vmatprep.mubr.bf16.mxu1 %v1008_v54 }
  0x94   : > { %v1229_v7 = vpop.permute.xlu1 %314  ;;  %v1231_v8 = vpop.permute.xlu0 %309 }
  0x98   : > { %v325_v9 = vpop.permute.xlu1 %324  ;;  %v320_v10 = vpop.permute.xlu0 %319 }
  0x9a   : > { %640 = vmatmul.mubr.bf16.gmra.mrb[4].mxu0 %v1010_v55  ;;  %680 = vmatmul.mubr.bf16.gmra.mrb[4].mxu1 %v1011_v56 }
  0x9b   : > { %649 = vmatprep.mubr.bf16.mxu0 %v1012_v57  ;;  %689 = vmatprep.mubr.bf16.mxu1 %v1014_v58 }
  0x9c   : > { %v335_v27 = vpop.permute.xlu1 %334  ;;  %v330_v28 = vpop.permute.xlu0 %329 }
  0xa0   : > { %v345_v45 = vpop.permute.xlu1 %344  ;;  %v340_v46 = vpop.permute.xlu0 %339 }
  0xa2   : > { %650 = vmatmul.mubr.bf16.gmra.mrb[8].mxu0 %v1016_v59  ;;  %690 = vmatmul.mubr.bf16.gmra.mrb[8].mxu1 %v1017_v60 }
  0xa3   : > { %659 = vmatprep.mubr.bf16.mxu0 %v1018_v61  ;;  %699 = vmatprep.mubr.bf16.mxu1 %v1020_v62 }
  0xaa   : > { %660 = vmatmul.mubr.bf16.gmra.mrb[12].mxu0 %v1022_v63  ;;  %700 = vmatmul.mubr.bf16.gmra.mrb[12].mxu1 %v1023_v0  ;;  %v355_v63 = vpop.permute.xlu1 %354  ;;  %v350_v0 = vpop.permute.xlu0 %349 }
 0x165   : > { %v631_v11 = vpop.f32.mrb[0].mxu0  ;;  %v671_v12 = vpop.f32.mrb[0].mxu1 }
 0x166   : > { %v632_v13 = vadd.f32 %v631_v11, %v280_v2  ;;  %v672_v14 = vadd.f32 %v671_v12, %v320_v10  ;;  %v633_v15 = vpop.f32.mrb[1].mxu0  ;;  %v673_v16 = vpop.f32.mrb[1].mxu1 }
 0x167   : > { %v634_v17 = vadd.f32 %v633_v15, %v280_v2  ;;  %v674_v18 = vadd.f32 %v673_v16, %v320_v10  ;;  %v635_v19 = vpop.f32.mrb[2].mxu0  ;;  %v675_v20 = vpop.f32.mrb[2].mxu1 }
 0x168   : > { %710 = vst [vmem:[%s1238_s23] sm:$0xff] %v632_v13  ;;  %726 = vst [vmem:[%s1238_s23 + $0x80] sm:$0xff] %v672_v14  ;;  %v636_v21 = vadd.f32 %v635_v19, %v285_v4  ;;  %v676_v22 = vadd.f32 %v675_v20, %v325_v9  ;;  %v637_v23 = vpop.f32.mrb[3].mxu0  ;;  %v677_v24 = vpop.f32.mrb[3].mxu1 }
 0x169   : > { %711 = vst [vmem:[%s1238_s23 + $0x8] sm:$0xff] %v634_v17  ;;  %727 = vst [vmem:[%s1238_s23 + $0x88] sm:$0xff] %v674_v18  ;;  %v638_v25 = vadd.f32 %v637_v23, %v285_v4  ;;  %v678_v26 = vadd.f32 %v677_v24, %v325_v9 }
 0x16a   : > { %712 = vst [vmem:[%s1238_s23 + $0x10] sm:$0xff] %v636_v21  ;;  %728 = vst [vmem:[%s1238_s23 + $0x90] sm:$0xff] %v676_v22 }
 0x16b   : > { %713 = vst [vmem:[%s1238_s23 + $0x18] sm:$0xff] %v638_v25  ;;  %729 = vst [vmem:[%s1238_s23 + $0x98] sm:$0xff] %v678_v26 }
 0x16d   : > { %v641_v29 = vpop.f32.mrb[4].mxu0  ;;  %v681_v30 = vpop.f32.mrb[4].mxu1 }
 0x16e   : > { %v642_v31 = vadd.f32 %v641_v29, %v290_v1  ;;  %v682_v32 = vadd.f32 %v681_v30, %v330_v28  ;;  %v643_v33 = vpop.f32.mrb[5].mxu0  ;;  %v683_v34 = vpop.f32.mrb[5].mxu1 }
 0x16f   : > { %v644_v35 = vadd.f32 %v643_v33, %v290_v1  ;;  %v684_v36 = vadd.f32 %v683_v34, %v330_v28  ;;  %v645_v37 = vpop.f32.mrb[6].mxu0  ;;  %v685_v38 = vpop.f32.mrb[6].mxu1 }
 0x170   : > { %714 = vst [vmem:[%s1238_s23 + $0x20] sm:$0xff] %v642_v31  ;;  %730 = vst [vmem:[%s1238_s23 + $0xa0] sm:$0xff] %v682_v32  ;;  %v646_v39 = vadd.f32 %v645_v37, %v295_v3  ;;  %v686_v40 = vadd.f32 %v685_v38, %v335_v27  ;;  %v647_v41 = vpop.f32.mrb[7].mxu0  ;;  %v687_v42 = vpop.f32.mrb[7].mxu1 }
 0x171   : > { %715 = vst [vmem:[%s1238_s23 + $0x28] sm:$0xff] %v644_v35  ;;  %731 = vst [vmem:[%s1238_s23 + $0xa8] sm:$0xff] %v684_v36  ;;  %v648_v43 = vadd.f32 %v647_v41, %v295_v3  ;;  %v688_v44 = vadd.f32 %v687_v42, %v335_v27 }
 0x172   : > { %716 = vst [vmem:[%s1238_s23 + $0x30] sm:$0xff] %v646_v39  ;;  %732 = vst [vmem:[%s1238_s23 + $0xb0] sm:$0xff] %v686_v40 }
 0x173   : > { %717 = vst [vmem:[%s1238_s23 + $0x38] sm:$0xff] %v648_v43  ;;  %733 = vst [vmem:[%s1238_s23 + $0xb8] sm:$0xff] %v688_v44 }
 0x175   : > { %v651_v47 = vpop.f32.mrb[8].mxu0  ;;  %v691_v48 = vpop.f32.mrb[8].mxu1 }
 0x176   : > { %v652_v49 = vadd.f32 %v651_v47, %v1227_v6  ;;  %v692_v50 = vadd.f32 %v691_v48, %v340_v46  ;;  %v653_v51 = vpop.f32.mrb[9].mxu0  ;;  %v693_v52 = vpop.f32.mrb[9].mxu1 }
 0x177   : > { %v654_v53 = vadd.f32 %v653_v51, %v1227_v6  ;;  %v694_v54 = vadd.f32 %v693_v52, %v340_v46  ;;  %v655_v55 = vpop.f32.mrb[10].mxu0  ;;  %v695_v56 = vpop.f32.mrb[10].mxu1 }
 0x178   : > { %718 = vst [vmem:[%s1238_s23 + $0x40] sm:$0xff] %v652_v49  ;;  %734 = vst [vmem:[%s1238_s23 + $0xc0] sm:$0xff] %v692_v50  ;;  %v656_v57 = vadd.f32 %v655_v55, %v1225_v5  ;;  %v696_v58 = vadd.f32 %v695_v56, %v345_v45  ;;  %v657_v59 = vpop.f32.mrb[11].mxu0  ;;  %v697_v60 = vpop.f32.mrb[11].mxu1 }
 0x179   : > { %719 = vst [vmem:[%s1238_s23 + $0x48] sm:$0xff] %v654_v53  ;;  %735 = vst [vmem:[%s1238_s23 + $0xc8] sm:$0xff] %v694_v54  ;;  %v658_v61 = vadd.f32 %v657_v59, %v1225_v5  ;;  %v698_v62 = vadd.f32 %v697_v60, %v345_v45 }
 0x17a   : > { %720 = vst [vmem:[%s1238_s23 + $0x50] sm:$0xff] %v656_v57  ;;  %736 = vst [vmem:[%s1238_s23 + $0xd0] sm:$0xff] %v696_v58 }
 0x17b   : > { %721 = vst [vmem:[%s1238_s23 + $0x58] sm:$0xff] %v658_v61  ;;  %737 = vst [vmem:[%s1238_s23 + $0xd8] sm:$0xff] %v698_v62 }
 0x17d   : > { %v661_v1 = vpop.f32.mrb[12].mxu0  ;;  %v701_v2 = vpop.f32.mrb[12].mxu1 }
 0x17e   : > { %v662_v3 = vadd.f32 %v661_v1, %v1231_v8  ;;  %v702_v4 = vadd.f32 %v701_v2, %v350_v0  ;;  %v663_v6 = vpop.f32.mrb[13].mxu0  ;;  %v703_v9 = vpop.f32.mrb[13].mxu1 }
 0x17f   : > { %v664_v5 = vadd.f32 %v663_v6, %v1231_v8  ;;  %v704_v10 = vadd.f32 %v703_v9, %v350_v0  ;;  %v665_v11 = vpop.f32.mrb[14].mxu0  ;;  %v705_v12 = vpop.f32.mrb[14].mxu1 }
 0x180   : > { %722 = vst [vmem:[%s1238_s23 + $0x60] sm:$0xff] %v662_v3  ;;  %738 = vst [vmem:[%s1238_s23 + $0xe0] sm:$0xff] %v702_v4  ;;  %v666_v13 = vadd.f32 %v665_v11, %v1229_v7  ;;  %v706_v14 = vadd.f32 %v705_v12, %v355_v63  ;;  %v667_v15 = vpop.f32.mrb[15].mxu0  ;;  %v707_v16 = vpop.f32.mrb[15].mxu1 }
 0x181   : > { %723 = vst [vmem:[%s1238_s23 + $0x68] sm:$0xff] %v664_v5  ;;  %739 = vst [vmem:[%s1238_s23 + $0xe8] sm:$0xff] %v704_v10  ;;  %v668_v17 = vadd.f32 %v667_v15, %v1229_v7  ;;  %v708_v18 = vadd.f32 %v707_v16, %v355_v63 }
 0x182   : > { %724 = vst [vmem:[%s1238_s23 + $0x70] sm:$0xff] %v666_v13  ;;  %740 = vst [vmem:[%s1238_s23 + $0xf0] sm:$0xff] %v706_v14 }
 0x183   : > { %725 = vst [vmem:[%s1238_s23 + $0x78] sm:$0xff] %v668_v17  ;;  %741 = vst [vmem:[%s1238_s23 + $0xf8] sm:$0xff] %v708_v18 }
 0x184 PF: > { %s13_s14 = sadd.s32 1, %s1046_s14   ;;  %s1293_s12 = smov %s1042_s13 }
 0x185   : > { %p10_p5 = scmp.ge.s32.totalorder %s13_s14, 4   ;;  %s1294_s13 = smov %s1296_s15 }
 0x187   :  { %12 = sbr.rel (!%p10_p5) target bundleno = 2 (0x2), region = 62 }

</bundles_post_ra>
